<compile_context>
chip_gen: v7x
topology: tpu7x:2x2x1
jax: 0.10.0
libtpu: 0.0.40
codegen_flags: <defaults>
</compile_context>

<pallas_src>
import functools
import math

import jax
import jax.numpy as jnp
import numpy as np
from jax.experimental import pallas as pl
from jax.experimental.pallas import tpu as pltpu

HIGHEST = jax.lax.Precision.HIGHEST


# ----------------------------- projection GEMM ------------------------------

def _matmul_kernel(a_ref, b_ref, o_ref, acc_ref):
    """Tiled GEMM: bf16 operands, f32 accumulator carried across the K axis."""
    @pl.when(pl.program_id(2) == 0)
    def _():
        acc_ref[...] = jnp.zeros_like(acc_ref)

    acc_ref[...] += jnp.dot(a_ref[...], b_ref[...],
                            preferred_element_type=jnp.float32)

    @pl.when(pl.program_id(2) == pl.num_programs(2) - 1)
    def _():
        o_ref[...] = acc_ref[...].astype(o_ref.dtype)


def _pick_tile(dim, candidates):
    """Largest candidate tile that evenly divides `dim`, else the full dim."""
    for t in candidates:
        if dim >= t and dim % t == 0:
            return t
    return dim


def pallas_matmul(a, b, *, out_dtype=jnp.float32):
    """Dense projection GEMM. bf16 MXU inputs, f32 accumulation, tiled grid."""
    m, k = a.shape
    k2, n = b.shape
    assert k == k2
    a = a.astype(jnp.bfloat16)
    b = b.astype(jnp.bfloat16)
    tm = _pick_tile(m, (512, 256, 128))
    tn = _pick_tile(n, (512, 256, 128))
    tk = _pick_tile(k, (1024, 512, 256, 128))
    grid = (m // tm, n // tn, k // tk)
    return pl.pallas_call(
        _matmul_kernel,
        out_shape=jax.ShapeDtypeStruct((m, n), out_dtype),
        grid=grid,
        in_specs=[pl.BlockSpec((tm, tk), lambda i, j, kk: (i, kk)),
                  pl.BlockSpec((tk, tn), lambda i, j, kk: (kk, j))],
        out_specs=pl.BlockSpec((tm, tn), lambda i, j, kk: (i, j)),
        scratch_shapes=[pltpu.VMEM((tm, tn), jnp.float32)],
        compiler_params=pltpu.CompilerParams(
            dimension_semantics=("parallel", "parallel", "arbitrary")),
    )(a, b)


# ----------------------- fused retention + Wo kernel ------------------------

def _retention_kernel(q_ref, k_ref, v_ref, g_ref, cos_ref, sin_ref, w_ref,
                      wo_ref, o_ref, state_ref, *, scale, eps, chunk, kc):
    """Grid (B, time-block, H), H innermost.

    Per step: rotary (XLU roll + cos/sin tables) -> kc chunks of intra/inter
    chunk retention (bf16 MXU, f32 accumulate) -> gated RMSNorm -> per-head Wo
    matmul accumulated into the f32 (kc*chunk, D) output block.  The per-head
    recurrent (dk, dv) state lives in an (H, dk, dv) VMEM scratch that is
    carried across time blocks (the "arbitrary" middle grid axis).
    """
    c = pl.program_id(1)
    h = pl.program_id(2)
    blk, dk = q_ref.shape
    dv = v_ref.shape[-1]
    half = dk // 2

    @pl.when((c == 0) & (h == 0))
    def _():
        state_ref[...] = jnp.zeros_like(state_ref)

    @pl.when(h == 0)
    def _():
        o_ref[...] = jnp.zeros_like(o_ref)

    # ---- per-head decay factors, computed on-chip (tiny, no DMA) -----------
    hf = (jax.lax.broadcasted_iota(jnp.int32, (1, 1), 0) + h).astype(jnp.float32)
    gamma = 1.0 - jnp.exp((-5.0 - hf) * math.log(2.0))        # 1 - 2^-(5+h)
    lg = jnp.log(gamma)                                        # (1,1), < 0
    row = jax.lax.broadcasted_iota(jnp.int32, (chunk, chunk), 0).astype(jnp.float32)
    col = jax.lax.broadcasted_iota(jnp.int32, (chunk, chunk), 1).astype(jnp.float32)
    diff = row - col
    causal = diff >= 0.0
    dmat = jnp.where(causal, jnp.exp(jnp.where(causal, diff, 0.0) * lg), 0.0)
    i1 = jax.lax.broadcasted_iota(jnp.int32, (chunk, 1), 0).astype(jnp.float32)
    qdec = jnp.exp((i1 + 1.0) * lg)                 # gamma^(i+1)      (chunk,1)
    kdec = jnp.exp((chunk - 1.0 - i1) * lg)         # gamma^(C-1-j)    (chunk,1)
    cdec = jnp.exp(float(chunk) * lg)               # gamma^C          (1,1)

    # ---- fused rotary (NeoX rotate-half) via XLU roll + VPU select ----------
    lane = jax.lax.broadcasted_iota(jnp.int32, (blk, dk), 1)
    neg_first = lane < half
    cosf = cos_ref[...]
    sinf = sin_ref[...]

    def rope(x):                                    # x: (blk, dk) f32
        xr = pltpu.roll(x, shift=half, axis=1)      # [x2, x1]
        xr = jnp.where(neg_first, -xr, xr)          # [-x2, x1]
        return x * cosf + xr * sinf

    q_all = rope(q_ref[...].astype(jnp.float32)) * scale
    k_all = rope(k_ref[...].astype(jnp.float32))
    v_all = v_ref[...]
    g_all = g_ref[...].astype(jnp.float32)
    w = w_ref[...]                                  # (1, dv) f32
    wo = wo_ref[...]                                # (dv, D) bf16
    state = state_ref[h]                            # (dk, dv) f32

    for cc in range(kc):                            # static unroll over chunks
        sl = slice(cc * chunk, (cc + 1) * chunk)
        q = q_all[sl]
        k = k_all[sl]
        v = v_all[sl].astype(jnp.bfloat16)

        # intra-chunk retention: (Q K^T . D) V  (bf16 MXU, f32 accumulate)
        attn = jax.lax.dot_general(q.astype(jnp.bfloat16),
                                   k.astype(jnp.bfloat16),
                                   (((1,), (1,)), ((), ())),
                                   preferred_element_type=jnp.float32)
        p = (attn * dmat).astype(jnp.bfloat16)
        o = jax.lax.dot_general(p, v, (((1,), (0,)), ((), ())),
                                preferred_element_type=jnp.float32)
        # inter-chunk contribution from the carried recurrent state
        qd = (q * qdec).astype(jnp.bfloat16)
        o = o + jax.lax.dot_general(qd, state.astype(jnp.bfloat16),
                                    (((1,), (0,)), ((), ())),
                                    preferred_element_type=jnp.float32)
        # state update: S <- gamma^C S + sum_j gamma^(C-1-j) k_j v_j^T
        kd = (k * kdec).astype(jnp.bfloat16)
        state = cdec * state + jax.lax.dot_general(
            kd, v, (((0,), (0,)), ((), ())), preferred_element_type=jnp.float32)

        # FusedRMSNormSwishGate epilogue + fused per-head Wo projection
        gv = g_all[sl]
        var = jnp.mean(o * o, axis=-1, keepdims=True)
        o_n = o * jax.lax.rsqrt(var + eps) * w
        gated = (o_n * (gv * jax.nn.sigmoid(gv))).astype(jnp.bfloat16)
        o_ref[sl, :] += jax.lax.dot_general(gated, wo, (((1,), (0,)), ((), ())),
                                            preferred_element_type=jnp.float32)

    state_ref[h] = state


def retention_pallas(q, k, v, g, cos, sin, gnorm_w, wo_heads, *, scale, chunk,
                     kc, eps=1e-5):
    B, H, T, dk = q.shape
    dv = v.shape[-1]
    D = wo_heads.shape[-1]
    blk = kc * chunk
    assert T % blk == 0
    ncb = T // blk
    qk_spec = pl.BlockSpec((None, None, blk, dk), lambda b, c, h: (b, h, c, 0))
    vg_spec = pl.BlockSpec((None, None, blk, dv), lambda b, c, h: (b, h, c, 0))
    cs_spec = pl.BlockSpec((blk, dk), lambda b, c, h: (c, 0))
    kernel = functools.partial(_retention_kernel, scale=scale, eps=eps,
                               chunk=chunk, kc=kc)
    return pl.pallas_call(
        kernel,
        out_shape=jax.ShapeDtypeStruct((B, T, D), jnp.float32),
        grid=(B, ncb, H),
        in_specs=[qk_spec, qk_spec, vg_spec, vg_spec, cs_spec, cs_spec,
                  pl.BlockSpec((1, dv), lambda b, c, h: (0, 0)),
                  pl.BlockSpec((None, dv, D), lambda b, c, h: (h, 0, 0))],
        out_specs=pl.BlockSpec((None, blk, D), lambda b, c, h: (b, c, 0)),
        scratch_shapes=[pltpu.VMEM((H, dk, dv), jnp.float32)],
        compiler_params=pltpu.CompilerParams(
            # B parallel (megacore / 2-TC sharding); time-block axis carries
            # the recurrent state and the head axis accumulates the output,
            # so both must stay sequential ("arbitrary").
            dimension_semantics=("parallel", "arbitrary", "arbitrary")),
    )(q, k, v, g, cos, sin, gnorm_w, wo_heads)


# ------------------------------- glue (JAX) ---------------------------------

def rope_tables(T, dk, base=10000.0):
    half = dk // 2
    inv_freq = 1.0 / (base ** (jnp.arange(half, dtype=jnp.float32) / half))
    freqs = jnp.arange(T, dtype=jnp.float32)[:, None] * inv_freq[None, :]
    emb = jnp.concatenate([freqs, freqs], axis=-1)           # (T, dk)
    return jnp.cos(emb), jnp.sin(emb)


def apply_rotary(x, base=10000.0):
    # Reference-only rotary (NeoX rotate-half); the Pallas path uses the
    # precomputed cos/sin tables + an XLU roll inside the retention kernel.
    _, T, _, d = x.shape
    half = d // 2
    inv_freq = 1.0 / (base ** (jnp.arange(half, dtype=jnp.float32) / half))
    freqs = jnp.arange(T, dtype=jnp.float32)[:, None] * inv_freq[None, :]
    cos = jnp.cos(freqs)[None, :, None, :]
    sin = jnp.sin(freqs)[None, :, None, :]
    x1, x2 = x[..., :half], x[..., half:]
    return jnp.concatenate([x1 * cos - x2 * sin, x1 * sin + x2 * cos], axis=-1)


def init_params(key, hidden_size, num_heads, expand_k=1.0, expand_v=2.0):
    key_dim = int(hidden_size * expand_k)
    value_dim = int(hidden_size * expand_v)
    dv = value_dim // num_heads
    ks = jax.random.split(key, 5)

    def lin(k, fan_in, fan_out):
        return jax.random.normal(k, (fan_in, fan_out), jnp.float32) / np.sqrt(fan_in)

    Wq = lin(ks[0], hidden_size, key_dim)
    Wk = lin(ks[1], hidden_size, key_dim)
    Wv = lin(ks[2], hidden_size, value_dim)
    Wg = lin(ks[3], hidden_size, value_dim)
    Wo = lin(ks[4], value_dim, hidden_size)
    return dict(
        Wq=Wq, Wk=Wk, Wv=Wv, Wg=Wg, Wo=Wo,
        # Pre-cast fused weights to bf16 so no per-call weight-cast HBM pass.
        Wqkvg=jnp.concatenate([Wq, Wk, Wv, Wg], axis=1).astype(jnp.bfloat16),
        Wo_heads=Wo.reshape(num_heads, dv, hidden_size).astype(jnp.bfloat16),
        g_norm_weight=jnp.ones((dv,), jnp.float32),
        num_heads=num_heads, key_dim=key_dim, value_dim=value_dim,
    )


def sigma_attention_forward(params, hidden_states, *, chunk=None, kc=None):
    """Pallas implementation of SigmaAttention.forward -> (attn_out, None, None)."""
    B, T, D = hidden_states.shape
    H = params["num_heads"]
    key_dim, value_dim = params["key_dim"], params["value_dim"]
    dk, dv = key_dim // H, value_dim // H
    if chunk is None:
        chunk = min(128, T)
    if kc is None:
        kc = 1
        for cand in (8, 4, 2):                    # amortize per-step overhead
            if T % (chunk * cand) == 0:
                kc = cand
                break
    assert T % (chunk * kc) == 0

    # Fused q/k/v/g projection: one GEMM, activations read from HBM once.
    # f32 output keeps the retention inputs un-rounded; at production scale
    # this could be bf16 to halve the activation pass.
    x2d = hidden_states.reshape(B * T, D).astype(jnp.bfloat16)
    qkvg = pallas_matmul(x2d, params["Wqkvg"], out_dtype=jnp.float32)
    q2 = qkvg[:, :key_dim]
    k2 = qkvg[:, key_dim:2 * key_dim]
    v2 = qkvg[:, 2 * key_dim:2 * key_dim + value_dim]
    g2 = qkvg[:, 2 * key_dim + value_dim:]

    def heads(t, d):                   # (B*T, H*d) -> (B, H, T, d), XLA pass
        return t.reshape(B, T, H, d).transpose(0, 2, 1, 3)

    q4, k4 = heads(q2, dk), heads(k2, dk)          # rotary applied in-kernel
    v4, g4 = heads(v2, dv), heads(g2, dv)
    cos, sin = rope_tables(T, dk)

    gnorm_w = params["g_norm_weight"].reshape(1, dv).astype(jnp.float32)
    out = retention_pallas(q4, k4, v4, g4, cos, sin, gnorm_w,
                           params["Wo_heads"], scale=dk ** -0.5,
                           chunk=chunk, kc=kc)                  # (B, T, D) f32
    return out, None, None


# --------------------------- pure-JAX reference ------------------------------

def sigma_attention_ref(params, hidden_states, *, eps=1e-5):
    B, T, D = hidden_states.shape
    H = params["num_heads"]
    dk = params["key_dim"] // H
    dv = params["value_dim"] // H
    x = hidden_states.astype(jnp.float32)
    q = jnp.matmul(x, params["Wq"], precision=HIGHEST).reshape(B, T, H, dk)
    k = jnp.matmul(x, params["Wk"], precision=HIGHEST).reshape(B, T, H, dk)
    v = jnp.matmul(x, params["Wv"], precision=HIGHEST).reshape(B, T, H, dv)
    g = jnp.matmul(x, params["Wg"], precision=HIGHEST).reshape(B, T, H, dv)
    q = apply_rotary(q)
    k = apply_rotary(k)
    q, k, v, g = [t.transpose(0, 2, 1, 3) for t in (q, k, v, g)]
    gamma = 1.0 - jnp.exp2(-5.0 - jnp.arange(H, dtype=jnp.float32))
    scale = dk ** -0.5

    def step(S, inp):
        qt, kt, vt = inp
        S = gamma[None, :, None, None] * S + kt[..., :, None] * vt[..., None, :]
        ot = jnp.einsum("bhk,bhkv->bhv", qt * scale, S, precision=HIGHEST)
        return S, ot

    S0 = jnp.zeros((B, H, dk, dv), jnp.float32)
    _, o = jax.lax.scan(step, S0, (q.transpose(2, 0, 1, 3),
                                   k.transpose(2, 0, 1, 3),
                                   v.transpose(2, 0, 1, 3)))
    o = o.transpose(1, 2, 0, 3)                                   # (B,H,T,dv)
    rms = jax.lax.rsqrt(jnp.mean(o * o, axis=-1, keepdims=True) + eps)
    o = o * rms * params["g_norm_weight"] * (g * jax.nn.sigmoid(g))
    o = o.transpose(0, 2, 1, 3).reshape(B * T, H * dv)
    return jnp.matmul(o, params["Wo"], precision=HIGHEST).reshape(B, T, D)


if __name__ == "__main__":
    # hidden_size=256, num_attention_heads=2 -> dk=128 (lane-native), dv=256.
    B, T, D, H = 2, 64, 256, 2
    chunk, kc = 16, 2        # 2 chunks per grid step, 2 time blocks -> the
                             # recurrent state carry across grid steps and the
                             # in-step multi-chunk loop are both exercised.
    key = jax.random.PRNGKey(0)
    kp, kx = jax.random.split(key)
    params = init_params(kp, D, H)
    hidden_states = jax.random.normal(kx, (B, T, D), jnp.float32)

    out, attn_weights, past_kv = sigma_attention_forward(params, hidden_states,
                                                         chunk=chunk, kc=kc)
    out = jax.block_until_ready(out)

    ref = sigma_attention_ref(params, hidden_states)
    # bf16 MXU operands (f32 accumulation) vs an f32/HIGHEST reference.
    np.testing.assert_allclose(np.asarray(out), np.asarray(ref),
                               rtol=5e-2, atol=5e-2)
    assert out.shape == (B, T, D) and attn_weights is None and past_kv is None
    print("KERNEL_OK")
</pallas_src>

<mosaic_0001>
module attributes {stable_mosaic.version = 11 : i64} {
  func.func @_matmul_kernel(%arg0: i32, %arg1: i32, %arg2: i32, %arg3: memref<128x256xbf16, #tpu.memory_space<vmem>>, %arg4: memref<256x512xbf16, #tpu.memory_space<vmem>>, %arg5: memref<128x512xf32, #tpu.memory_space<vmem>>, %arg6: memref<128x512xf32, #tpu.memory_space<vmem>>) attributes {dimension_semantics = [#tpu.dimension_semantics<parallel>, #tpu.dimension_semantics<parallel>, #tpu.dimension_semantics<arbitrary>], iteration_bounds = array<i64: 1, 3, 1>, scalar_prefetch = 0 : i64, scratch_operands = 1 : i64, tpu.core_type = #tpu.core_type<tc>, window_params = [{transform_indices = @transform_0, window_bounds = array<i64: 128, 256>}, {transform_indices = @transform_1, window_bounds = array<i64: 256, 512>}, {transform_indices = @transform_2, window_bounds = array<i64: 128, 512>}]} {
    %c0_i32 = arith.constant 0 : i32
    %0 = arith.cmpi eq, %arg2, %c0_i32 : i32
    %1 = arith.extui %0 : i1 to i32
    %c0_i32_0 = arith.constant 0 : i32
    %2 = arith.cmpi ne, %1, %c0_i32_0 : i32
    scf.if %2 {
      %cst_10 = arith.constant 0.000000e+00 : f32
      %12 = vector.broadcast %cst_10 : f32 to vector<128x512xf32>
      %c0_11 = arith.constant 0 : index
      %c0_12 = arith.constant 0 : index
      %13 = vector.load %arg6[%c0_11, %c0_12] : memref<128x512xf32, #tpu.memory_space<vmem>>, vector<128x512xf32>
      tpu.vector_store %arg6[%c0_11, %c0_12], %12 {strides = array<i32>} : memref<128x512xf32, #tpu.memory_space<vmem>>, vector<128x512xf32>,
    } else {
    }
    %c0 = arith.constant 0 : index
    %c0_1 = arith.constant 0 : index
    %3 = vector.load %arg6[%c0, %c0_1] : memref<128x512xf32, #tpu.memory_space<vmem>>, vector<128x512xf32>
    %c0_2 = arith.constant 0 : index
    %c0_3 = arith.constant 0 : index
    %4 = vector.load %arg3[%c0_2, %c0_3] : memref<128x256xbf16, #tpu.memory_space<vmem>>, vector<128x256xbf16>
    %c0_4 = arith.constant 0 : index
    %c0_5 = arith.constant 0 : index
    %5 = vector.load %arg4[%c0_4, %c0_5] : memref<256x512xbf16, #tpu.memory_space<vmem>>, vector<256x512xbf16>
    %cst = arith.constant dense<0.000000e+00> : vector<128x512xf32>
    %6 = tpu.matmul %4, %5, %cst {dimension_numbers = #tpu.dot_dimension_numbers<[1], [0], [0], [1], [0, 0, 1, 1], [], []>} : vector<128x256xbf16>, vector<256x512xbf16>, vector<128x512xf32> -> vector<128x512xf32>
    %7 = arith.addf %3, %6 : vector<128x512xf32>
    %c0_6 = arith.constant 0 : index
    %c0_7 = arith.constant 0 : index
    %8 = vector.load %arg6[%c0_6, %c0_7] : memref<128x512xf32, #tpu.memory_space<vmem>>, vector<128x512xf32>
    tpu.vector_store %arg6[%c0_6, %c0_7], %7 {strides = array<i32>} : memref<128x512xf32, #tpu.memory_space<vmem>>, vector<128x512xf32>,
    %c0_i32_8 = arith.constant 0 : i32
    %9 = arith.cmpi eq, %arg2, %c0_i32_8 : i32
    %10 = arith.extui %9 : i1 to i32
    %c0_i32_9 = arith.constant 0 : i32
    %11 = arith.cmpi ne, %10, %c0_i32_9 : i32
    scf.if %11 {
      %c0_10 = arith.constant 0 : index
      %c0_11 = arith.constant 0 : index
      %12 = vector.load %arg6[%c0_10, %c0_11] : memref<128x512xf32, #tpu.memory_space<vmem>>, vector<128x512xf32>
      %c0_12 = arith.constant 0 : index
      %c0_13 = arith.constant 0 : index
      %13 = vector.load %arg5[%c0_12, %c0_13] : memref<128x512xf32, #tpu.memory_space<vmem>>, vector<128x512xf32>
      tpu.vector_store %arg5[%c0_12, %c0_13], %12 {strides = array<i32>} : memref<128x512xf32, #tpu.memory_space<vmem>>, vector<128x512xf32>,
    } else {
    }
    return
  }
  func.func @transform_0(%arg0: i32, %arg1: i32, %arg2: i32) -> (i32, i32) {
    %c0_i32 = arith.constant 0 : i32
    return %arg0, %arg2 : i32, i32
  }
  func.func @transform_1(%arg0: i32, %arg1: i32, %arg2: i32) -> (i32, i32) {
    %c0_i32 = arith.constant 0 : i32
    return %arg2, %arg1 : i32, i32
  }
  func.func @transform_2(%arg0: i32, %arg1: i32, %arg2: i32) -> (i32, i32) {
    %c0_i32 = arith.constant 0 : i32
    return %arg0, %arg1 : i32, i32
  }
}

</mosaic_0001>

<bundles_post_ra>
// kernel: tpu_custom_call.1
= control target key start
LH: loop header
LB: loop body
LE: loop exit
PB: predicated region body
PF: predicated region fallthrough
CT: control target
= control target key end

     0   :  { %7 = vsyncpa [#allocation4], 0  ;;  %s2263_s0 = inlined_call_operand.hbm [shape: bf16[128,256], index: 0, kind: input, shape index: {}]   ;;  %s2264_s1 = inlined_call_operand.hbm [shape: bf16[256,1536], index: 1, kind: input, shape index: {}]   ;;  %s2265_s2 = inlined_call_operand.hbm [shape: f32[128,1536], index: 2, kind: output, shape index: {}]  }
   0x1   :  { %8 = vsyncpa [#allocation7], 0 }
   0x2   :  { %10 = vsyncpa [#allocation7 + $0x1], 0 }
   0x3   :  { %11 = vsyncpa [#allocation5], 0 }
   0x4   :  { %13 = vsyncpa [#allocation5 + $0x1], 0  ;;  %s1915_s9 = smov 0   ;;  %s1917_s10 = smov 0  }
   0x5   :  { %s1919_s11 = smov 0   ;;  %s1921_s12 = smov 0  }
   0x6   :  { %s1923_s13 = smov 0   ;;  %s1925_s14 = smov 0  }
   0x7 LB: > { %s1443_s15 = sadd.s32 4294967295, %s1887_s14   ;;  %s1444_s16 = sadd.s32 4294967294, %s1887_s14   ;;  %s1887_s14 = sphi %s1925_s14, %s19_s14   ;;  %s1883_s13 = sphi %s1923_s13, %s2290_s13   ;;  %s1879_s12 = sphi %s1921_s12, %s2289_s12   ;;  %s1875_s11 = sphi %s1919_s11, %s2288_s11   ;;  %s1871_s10 = sphi %s1917_s10, %s2287_s10   ;;  %s1867_s9 = sphi %s1915_s9, %s2286_s9  }
   0x8   : > { %p82_p0 = scmp.ne.s32.totalorder %s1875_s11, %s1871_s10  ;;  %p83_p1 = scmp.eq.s32.totalorder %s1887_s14, 0 }
   0x9   : > { %p88_p2 = scmp.ne.s32.totalorder %s1871_s10, %s1867_s9  ;;  %p1952_p3 = scmp.eq.s32.totalorder %s1443_s15, 0 }
   0xa   : > { %p1956_p4 = por %p83_p1, %p82_p0  ;;  %p114_p5 = scmp.eq.s32.totalorder %s1443_s15, 2 }
   0xb   : > { %s2272_s17 = scalar_select %p1952_p3, 1, 0 }
   0xc   : > { %p1962_p6 = por %p1952_p3, %p88_p2  ;;  %p120_p7 = scmp.eq.s32.totalorder %s1444_s16, 2 }
   0xd   : > { %p1966_p8 = por %p114_p5, %p82_p0  ;;  %p1445_p9 = scmp.ge.s32.totalorder %s1887_s14, 1 }
   0xe   : > { %s2274_s19 = scalar_select %p1962_p6, 1, 0 }
   0xf   : > { %s2275_s20 = scalar_select %p1966_p8, 1, 0 }
  0x10   : > { %p1971_p10 = por %p120_p7, %p88_p2  ;;  %p127_p11 = scmp.lt.s32.totalorder %s1887_s14, 4 }
  0x11   : > { %s1889_s23 = smov [#allocation3]   ;;  %p1563_p0 = scmp.lt.s32.totalorder %s1887_s14, 3 }
  0x12   : > { %s2276_s21 = scalar_select %p1971_p10, 1, 0 }
  0x13   : > { %p1976_p12 = pnand %p1445_p9, %p127_p11  ;;  %s145_s24 = sshll.u32 %s1889_s23, 4  ;;  %s146_s24 = int_to_ptr.vmem [resolvable:$true] %s145_s24 }
  0x14   : > { %p1991_p2 = pnand %p1563_p0, %p1956_p4  ;;  %s34_s27 = sadd.s32 1, %s1883_s13 }
  0x15   : > { %s2277_s22 = scalar_select %p1976_p12, 1, 0 }
  0x16   : > { %p1550_p13 = pneg %p1976_p12  ;;  %s1743_s30 = scalar_lea.hbm %s2263_s0, 2048 }
  0x17   : > { %s2279_s26 = scalar_select %p1991_p2, 1, 0 }
  0x18   : > { %p1985_p1 = pnand %p1550_p13, %p1952_p3  ;;  %p1744_p5 = scmp.ne.s32.totalorder %s2263_s0, %s1743_s30 }
  0x19   : > { %p1750_p4 = scmp.lt.u32.totalorder %s1743_s30, %s2263_s0 }
  0x1a   : > { %p1745_p7 = pneg %p1985_p1 }
  0x1c   : > { %p1746_p9 = pnand %p1745_p7, %p1744_p5 }
  0x1e   : > { %p1747_p11 = pneg %p1746_p9 }
  0x20   : > { %p1752_p13 = pnand %p1750_p4, %p1747_p11 }
  0x22   : > { %1755 = shalt.err (!%p1752_p13)
}
  0x23   : > { %s1756_s7 = scalar_lea.vmem %s146_s24, 2048  ;;  %p1764_p6 = scmp.lt.s32.totalorder %s146_s24, %s146_s24 }
  0x24   : > { %p1757_p0 = scmp.ne.s32.totalorder %s146_s24, %s1756_s7  ;;  %p1765_p3 = scmp.lt.s32.totalorder %s1756_s7, %s1756_s7 }
  0x26   : > { %p1759_p10 = pnand %p1757_p0, %p1745_p7  ;;  %p1766_p12 = por %p1765_p3, %p1764_p6 }
  0x28   : > { %p1760_p8 = pneg %p1759_p10 }
  0x2a   : > { %p1767_p2 = pnand %p1766_p12, %p1760_p8 }
  0x2c   : > { %1770 = shalt.err (!%p1767_p2)
}
  0x2d   : > { %s1890_s8 = smov 128   ;;  %s1891_s15 = smov 8  }
  0x2e   : > { %1553 = dma.hbm_to_vmem [thread:$0]  (!%p1985_p1), %s2263_s0, 2048, %s146_s24, [#allocation4], %s1890_s8, %s1890_s8, %s1891_s15  }
  0x2f   : > { %p36_p5 = scmp.ge.s32.totalorder %s34_s27, 3  ;;  %s75_s23 = sadd.s32 1, %s1875_s11 }
  0x30   : > { %s159_s28 = sand.u32 1, %s1875_s11   ;;  %s1540_s3 = sshll.u32 %s1883_s13, 8 }
  0x31   : > { %s2292_s27 = smov (%p36_p5, %s34_s27), 0  ;;  %s1448_s29 = sshll.u32 %s159_s28, 9 }
  0x32   : > { %s71_s30 = ssub.s32 %s1883_s13, %s2292_s27  ;;  %s2022_s25 = scalar_lea.hbm %s2264_s1, %s1540_s3 }
  0x33   : > { %p73_p3 = scmp.eq.s32.totalorder %s71_s30, 0  ;;  %s163_s24 = scalar_lea.vmem [#allocation6], %s1448_s29 }
  0x34   : > { %s173_s6 = sshll.u32 %s163_s24, 4  ;;  %s2029_s8 = scalar_lea.sflag [#allocation7], %s159_s28  ;;  %s2027_s6 = int_to_ptr.vmem [resolvable:$true] %s173_s6 }
  0x35   : > { %s2025_s7 = scalar_select %p73_p3, %s1875_s11, %s75_s23  }
  0x36   : > { %s1771_s15 = scalar_lea.hbm %s2022_s25, 8192  ;;  %p2280_p8 = scmp.ne.s32.totalorder %s2279_s26, 0 }
  0x37   : > { %p1772_p6 = scmp.ne.s32.totalorder %s2022_s25, %s1771_s15  ;;  %s1776_s30 = scalar_lea.hbm %s2264_s1, 24576 }
  0x38   : > { %p1773_p10 = pneg %p2280_p8  ;;  %p1777_p2 = scmp.lt.u32.totalorder %s2022_s25, %s2264_s1 }
  0x39   : > { %p1778_p7 = scmp.lt.u32.totalorder %s1776_s30, %s1771_s15  ;;  %p1780_p11 = scmp.lt.u32.totalorder %s1771_s15, %s2022_s25 }
  0x3a   : > { %p1774_p12 = pnand %p1773_p10, %p1772_p6 }
  0x3b   : > { %p1779_p9 = por %p1778_p7, %p1777_p2 }
  0x3c   : > { %p1775_p1 = pneg %p1774_p12 }
  0x3d   : > { %p1781_p4 = por %p1780_p11, %p1779_p9 }
  0x3f   : > { %p1782_p13 = pnand %p1781_p4, %p1775_p1 }
  0x41   : > { %1785 = shalt.err (!%p1782_p13)
}
  0x42   : > { %s1786_s23 = scalar_lea.vmem %s2027_s6, 8192  ;;  %s1892_s28 = smov [#allocation6]  }
  0x43   : > { %p1787_p0 = scmp.ne.s32.totalorder %s2027_s6, %s1786_s23  ;;  %s1791_s4 = sshll.u32 %s1892_s28, 4  ;;  %s1792_s4 = int_to_ptr.vmem [resolvable:$false] %s1791_s4 }
  0x44   : > { %s1793_s5 = scalar_lea.vmem %s1792_s4, 16384  ;;  %p1794_p6 = scmp.lt.s32.totalorder %s2027_s6, %s1792_s4 }
  0x45   : > { %p1789_p5 = pnand %p1787_p0, %p1773_p10  ;;  %p1795_p12 = scmp.lt.s32.totalorder %s1793_s5, %s1786_s23 }
  0x47   : > { %p1790_p3 = pneg %p1789_p5  ;;  %p1796_p2 = por %p1795_p12, %p1794_p6 }
  0x49   : > { %p1797_p7 = pnand %p1796_p2, %p1790_p3 }
  0x4b   : > { %1800 = shalt.err (!%p1797_p7)
}
  0x4c   : > { %s1893_s24 = smov 768   ;;  %s1894_s15 = smov 256  }
  0x4d   : > { %s1895_s16 = smov 16   ;;  %p2281_p10 = scmp.ne.s32.totalorder %s2277_s22, 0 }
  0x4e   : > { %1557 = dma.hbm_to_vmem [thread:$0]  (!%p2280_p8), %s2022_s25, 8192, %s2027_s6, %s2029_s8, %s1893_s24, %s1894_s15, %s1895_s16  }
  0x4f   : > { %185 = sbr.rel (%p2281_p10) target bundleno = 443 (0x1bb), region = 28  ;;  %p2282_p1 = scmp.ne.s32.totalorder (!%p2281_p10), %s2272_s17, 0 }
  0x56   : > { %1854 = dma.done.wait (%p2282_p1), [#allocation4], 2048  }
  0x57   : > { %1856 = vsyncadd (%p2282_p1), [#allocation4], 4294965248  ;;  %s2064_s18 = sand.u32 1, %s1871_s10   ;;  %p2283_p8 = scmp.ne.s32.totalorder %s2274_s19, 0 }
  0x58   : > { %s1453_s30 = sshll.u32 %s2064_s18, 9  ;;  %s192_s29 = scalar_lea.sflag [#allocation7], %s2064_s18 }
  0x59   : > { %s2070_s26 = scalar_lea.vmem [#allocation6], %s1453_s30 }
  0x5a   : > { %1858 = dma.done.wait (%p2283_p8), %s192_s29, 8192  }
  0x5b   : > { %1860 = vsyncadd (%p2283_p8), %s192_s29, 4294959104  ;;  %v1623_v0 = vld [vmem:[%s2070_s26 + $0x4] ss:$16 sps:$4 sm:$0xff]   ;;  %v1625_v1 = vld [vmem:[%s2070_s26 + $0xc] ss:$16 sps:$4 sm:$0xff]   ;;  %s2142_s17 = scalar_lea.vmem [#allocation8], %s1453_s30 }
  0x5c   : > { %834 = vmatprep.subr.bf16.mxu0 %v1623_v0  ;;  %v1627_v2 = vld [vmem:[%s2070_s26] ss:$16 sps:$4 sm:$0xff]   ;;  %v1628_v3 = vld [vmem:[%s2070_s26 + $0x8] ss:$16 sps:$4 sm:$0xff]   ;;  %947 = vmatprep.subr.bf16.mxu1 %v1625_v1  ;;  %v1629_v4 = vld [vmem:[%s2070_s26 + $0x24] ss:$16 sps:$4 sm:$0xff]  }
  0x5d   : > { %835 = vmatpush1.bf16.msra.mxu0 %v1627_v2  ;;  %948 = vmatpush1.bf16.msra.mxu1 %v1628_v3  ;;  %v1631_v5 = vld [vmem:[%s2070_s26 + $0x2c] ss:$16 sps:$4 sm:$0xff]   ;;  %v1633_v6 = vld [vmem:[%s2070_s26 + $0x20] ss:$16 sps:$4 sm:$0xff]   ;;  %v1634_v7 = vld [vmem:[%s2070_s26 + $0x28] ss:$16 sps:$4 sm:$0xff]  }
  0x5e   : > { %836 = vmatprep.subr.bf16.mxu0 %v1629_v4  ;;  %949 = vmatprep.subr.bf16.mxu1 %v1631_v5  ;;  %v1635_v8 = vld [vmem:[%s2070_s26 + $0x44] ss:$16 sps:$4 sm:$0xff]   ;;  %v1637_v9 = vld [vmem:[%s2070_s26 + $0x4c] ss:$16 sps:$4 sm:$0xff]   ;;  %v1639_v10 = vld [vmem:[%s2070_s26 + $0x40] ss:$16 sps:$4 sm:$0xff]  }
  0x5f   : > { %v1640_v11 = vld [vmem:[%s2070_s26 + $0x48] ss:$16 sps:$4 sm:$0xff]   ;;  %v1641_v12 = vld [vmem:[%s2070_s26 + $0x64] ss:$16 sps:$4 sm:$0xff]   ;;  %v1643_v13 = vld [vmem:[%s2070_s26 + $0x6c] ss:$16 sps:$4 sm:$0xff]  }
  0x60   : > { %v1645_v14 = vld [vmem:[%s2070_s26 + $0x60] ss:$16 sps:$4 sm:$0xff]   ;;  %v1646_v15 = vld [vmem:[%s2070_s26 + $0x68] ss:$16 sps:$4 sm:$0xff]   ;;  %v1647_v16 = vld [vmem:[%s2070_s26 + $0x84] ss:$16 sps:$4 sm:$0xff]  }
  0x61   : > { %837 = vmatpush1.bf16.msra.mxu0 %v1633_v6  ;;  %950 = vmatpush1.bf16.msra.mxu1 %v1634_v7  ;;  %v1649_v17 = vld [vmem:[%s2070_s26 + $0x8c] ss:$16 sps:$4 sm:$0xff]   ;;  %v1651_v18 = vld [vmem:[%s2070_s26 + $0x80] ss:$16 sps:$4 sm:$0xff]   ;;  %v1652_v19 = vld [vmem:[%s2070_s26 + $0x88] ss:$16 sps:$4 sm:$0xff]  }
  0x62   : > { %838 = vmatprep.subr.bf16.mxu0 %v1635_v8  ;;  %951 = vmatprep.subr.bf16.mxu1 %v1637_v9  ;;  %v1653_v20 = vld [vmem:[%s2070_s26 + $0xa4] ss:$16 sps:$4 sm:$0xff]   ;;  %v1655_v21 = vld [vmem:[%s2070_s26 + $0xac] ss:$16 sps:$4 sm:$0xff]   ;;  %v1657_v22 = vld [vmem:[%s2070_s26 + $0xa0] ss:$16 sps:$4 sm:$0xff]  }
  0x63   : > { %v1658_v23 = vld [vmem:[%s2070_s26 + $0xa8] ss:$16 sps:$4 sm:$0xff]   ;;  %v1659_v24 = vld [vmem:[%s2070_s26 + $0xc4] ss:$16 sps:$4 sm:$0xff]   ;;  %v1661_v25 = vld [vmem:[%s2070_s26 + $0xcc] ss:$16 sps:$4 sm:$0xff]  }
  0x64   : > { %v1663_v26 = vld [vmem:[%s2070_s26 + $0xc0] ss:$16 sps:$4 sm:$0xff]   ;;  %v1664_v27 = vld [vmem:[%s2070_s26 + $0xc8] ss:$16 sps:$4 sm:$0xff]   ;;  %v1665_v28 = vld [vmem:[%s2070_s26 + $0xe4] ss:$16 sps:$4 sm:$0xff]  }
  0x65   : > { %839 = vmatpush1.bf16.msra.mxu0 %v1639_v10  ;;  %952 = vmatpush1.bf16.msra.mxu1 %v1640_v11  ;;  %v1667_v29 = vld [vmem:[%s2070_s26 + $0xec] ss:$16 sps:$4 sm:$0xff]   ;;  %v1669_v30 = vld [vmem:[%s2070_s26 + $0xe0] ss:$16 sps:$4 sm:$0xff]   ;;  %v1670_v31 = vld [vmem:[%s2070_s26 + $0xe8] ss:$16 sps:$4 sm:$0xff]  }
  0x66   : > { %840 = vmatprep.subr.bf16.mxu0 %v1641_v12  ;;  %953 = vmatprep.subr.bf16.mxu1 %v1643_v13  ;;  %v1671_v32 = vld [vmem:[%s2070_s26 + $0x104] ss:$16 sps:$4 sm:$0xff]   ;;  %v1673_v33 = vld [vmem:[%s2070_s26 + $0x10c] ss:$16 sps:$4 sm:$0xff]   ;;  %v1675_v34 = vld [vmem:[%s2070_s26 + $0x100] ss:$16 sps:$4 sm:$0xff]  }
  0x67   : > { %v1676_v35 = vld [vmem:[%s2070_s26 + $0x108] ss:$16 sps:$4 sm:$0xff]   ;;  %v1677_v36 = vld [vmem:[%s2070_s26 + $0x124] ss:$16 sps:$4 sm:$0xff]   ;;  %v1679_v37 = vld [vmem:[%s2070_s26 + $0x12c] ss:$16 sps:$4 sm:$0xff]  }
  0x68   : > { %v1681_v38 = vld [vmem:[%s2070_s26 + $0x120] ss:$16 sps:$4 sm:$0xff]   ;;  %v1682_v39 = vld [vmem:[%s2070_s26 + $0x128] ss:$16 sps:$4 sm:$0xff]   ;;  %v1683_v40 = vld [vmem:[%s2070_s26 + $0x144] ss:$16 sps:$4 sm:$0xff]  }
  0x69   : > { %841 = vmatpush1.bf16.msra.mxu0 %v1645_v14  ;;  %954 = vmatpush1.bf16.msra.mxu1 %v1646_v15  ;;  %v1685_v41 = vld [vmem:[%s2070_s26 + $0x14c] ss:$16 sps:$4 sm:$0xff]   ;;  %v1687_v42 = vld [vmem:[%s2070_s26 + $0x140] ss:$16 sps:$4 sm:$0xff]   ;;  %v1688_v43 = vld [vmem:[%s2070_s26 + $0x148] ss:$16 sps:$4 sm:$0xff]  }
  0x6a   : > { %842 = vmatprep.subr.bf16.mxu0 %v1647_v16  ;;  %955 = vmatprep.subr.bf16.mxu1 %v1649_v17  ;;  %v1689_v44 = vld [vmem:[%s2070_s26 + $0x164] ss:$16 sps:$4 sm:$0xff]   ;;  %v1691_v45 = vld [vmem:[%s2070_s26 + $0x16c] ss:$16 sps:$4 sm:$0xff]   ;;  %v1693_v46 = vld [vmem:[%s2070_s26 + $0x160] ss:$16 sps:$4 sm:$0xff]  }
  0x6b   : > { %v1694_v47 = vld [vmem:[%s2070_s26 + $0x168] ss:$16 sps:$4 sm:$0xff]   ;;  %v1721_v48 = vld [vmem:[#allocation3 + $0x4] ss:$8 sps:$4 sm:$0xff]   ;;  %v1699_v51 = vld [vmem:[%s2070_s26 + $0x180] ss:$16 sps:$4 sm:$0xff]  }
  0x6c   : > { %v1695_v49 = vld [vmem:[%s2070_s26 + $0x184] ss:$16 sps:$4 sm:$0xff]   ;;  %v1697_v50 = vld [vmem:[%s2070_s26 + $0x18c] ss:$16 sps:$4 sm:$0xff]   ;;  %866 = vmatprep.mubr.bf16.mxu0 %v1721_v48  ;;  %979 = vmatprep.mubr.bf16.mxu1 %v1721_v48  ;;  %v1700_v52 = vld [vmem:[%s2070_s26 + $0x188] ss:$16 sps:$4 sm:$0xff]  }
  0x6d   : > { %843 = vmatpush1.bf16.msra.mxu0 %v1651_v18  ;;  %956 = vmatpush1.bf16.msra.mxu1 %v1652_v19  ;;  %v1701_v53 = vld [vmem:[%s2070_s26 + $0x1a4] ss:$16 sps:$4 sm:$0xff]   ;;  %v1703_v54 = vld [vmem:[%s2070_s26 + $0x1ac] ss:$16 sps:$4 sm:$0xff]   ;;  %v1705_v55 = vld [vmem:[%s2070_s26 + $0x1a0] ss:$16 sps:$4 sm:$0xff]  }
  0x6e   : > { %844 = vmatprep.subr.bf16.mxu0 %v1653_v20  ;;  %957 = vmatprep.subr.bf16.mxu1 %v1655_v21  ;;  %v1706_v56 = vld [vmem:[%s2070_s26 + $0x1a8] ss:$16 sps:$4 sm:$0xff]   ;;  %v1707_v57 = vld [vmem:[%s2070_s26 + $0x1c4] ss:$16 sps:$4 sm:$0xff]   ;;  %v1709_v58 = vld [vmem:[%s2070_s26 + $0x1cc] ss:$16 sps:$4 sm:$0xff]  }
  0x6f   : > { %v1711_v59 = vld [vmem:[%s2070_s26 + $0x1c0] ss:$16 sps:$4 sm:$0xff]   ;;  %v1712_v60 = vld [vmem:[%s2070_s26 + $0x1c8] ss:$16 sps:$4 sm:$0xff]   ;;  %v1713_v61 = vld [vmem:[%s2070_s26 + $0x1e4] ss:$16 sps:$4 sm:$0xff]  }
  0x70   : > { %v1715_v62 = vld [vmem:[%s2070_s26 + $0x1ec] ss:$16 sps:$4 sm:$0xff]   ;;  %v1717_v63 = vld [vmem:[%s2070_s26 + $0x1e0] ss:$16 sps:$4 sm:$0xff]   ;;  %v1718_v0 = vld [vmem:[%s2070_s26 + $0x1e8] ss:$16 sps:$4 sm:$0xff]  }
  0x71   : > { %845 = vmatpush1.bf16.msra.mxu0 %v1657_v22  ;;  %958 = vmatpush1.bf16.msra.mxu1 %v1658_v23  ;;  %v1719_v1 = vld [vmem:[#allocation3] ss:$8 sps:$4 sm:$0xff]   ;;  %v1722_v2 = vld [vmem:[#allocation3 + $0x14] ss:$8 sps:$4 sm:$0xff]   ;;  %v1724_v3 = vld [vmem:[#allocation3 + $0x10] ss:$8 sps:$4 sm:$0xff]  }
  0x72   : > { %846 = vmatprep.subr.bf16.mxu0 %v1659_v24  ;;  %959 = vmatprep.subr.bf16.mxu1 %v1661_v25  ;;  %v1725_v4 = vld [vmem:[#allocation3 + $0x24] ss:$8 sps:$4 sm:$0xff]   ;;  %v1727_v5 = vld [vmem:[#allocation3 + $0x20] ss:$8 sps:$4 sm:$0xff]   ;;  %v1728_v6 = vld [vmem:[#allocation3 + $0x34] ss:$8 sps:$4 sm:$0xff]  }
  0x73   : > { %v1730_v7 = vld [vmem:[#allocation3 + $0x30] ss:$8 sps:$4 sm:$0xff]   ;;  %v1731_v8 = vld [vmem:[#allocation3 + $0x44] ss:$8 sps:$4 sm:$0xff]   ;;  %v1733_v9 = vld [vmem:[#allocation3 + $0x40] ss:$8 sps:$4 sm:$0xff]  }
  0x74   : > { %v1734_v10 = vld [vmem:[#allocation3 + $0x54] ss:$8 sps:$4 sm:$0xff]   ;;  %v1736_v11 = vld [vmem:[#allocation3 + $0x50] ss:$8 sps:$4 sm:$0xff]   ;;  %v1737_v12 = vld [vmem:[#allocation3 + $0x64] ss:$8 sps:$4 sm:$0xff]  }
  0x75   : > { %847 = vmatpush1.bf16.msra.mxu0 %v1663_v26  ;;  %960 = vmatpush1.bf16.msra.mxu1 %v1664_v27  ;;  %v1739_v13 = vld [vmem:[#allocation3 + $0x60] ss:$8 sps:$4 sm:$0xff]   ;;  %v1740_v14 = vld [vmem:[#allocation3 + $0x74] ss:$8 sps:$4 sm:$0xff]   ;;  %v1742_v15 = vld [vmem:[#allocation3 + $0x70] ss:$8 sps:$4 sm:$0xff]  }
  0x76   : > { %848 = vmatprep.subr.bf16.mxu0 %v1665_v28  ;;  %961 = vmatprep.subr.bf16.mxu1 %v1667_v29  ;;  %s1541_s19 = sshll.u32 %s1879_s12, 9  ;;  %s1336_s22 = sshll.u32 %s2142_s17, 4  ;;  %s2209_s22 = int_to_ptr.vmem [resolvable:$true] %s1336_s22 }
  0x77   : > { %s2205_s8 = scalar_lea.hbm %s2265_s2, %s1541_s19  ;;  %s1320_s12 = scalar_lea.sflag [#allocation5], %s2064_s18 }
  0x78   : > { %s1801_s3 = scalar_lea.vmem %s2209_s22, 8192  ;;  %p2284_p11 = scmp.ne.s32.totalorder %s2275_s20, 0 }
  0x79   : > { %849 = vmatpush1.bf16.msra.mxu0 %v1669_v30  ;;  %962 = vmatpush1.bf16.msra.mxu1 %v1670_v31  ;;  %p1802_p9 = scmp.ne.s32.totalorder %s2209_s22, %s1801_s3  ;;  %s1896_s23 = smov [#allocation8]  }
  0x7a   : > { %850 = vmatprep.subr.bf16.mxu0 %v1671_v32  ;;  %963 = vmatprep.subr.bf16.mxu1 %v1673_v33  ;;  %s1805_s28 = sshll.u32 %s1896_s23, 4  ;;  %s1806_s28 = int_to_ptr.vmem [resolvable:$false] %s1805_s28 }
  0x7b   : > { %p1803_p4 = pnand %p1802_p9, %p2284_p11  ;;  %s1807_s4 = scalar_lea.vmem %s1806_s28, 16384 }
  0x7c   : > { %p1808_p0 = scmp.lt.s32.totalorder %s2209_s22, %s1806_s28  ;;  %p1809_p5 = scmp.lt.s32.totalorder %s1807_s4, %s1801_s3 }
  0x7d   : > { %851 = vmatpush1.bf16.msra.mxu0 %v1675_v34  ;;  %964 = vmatpush1.bf16.msra.mxu1 %v1676_v35  ;;  %p1804_p13 = pneg %p1803_p4 }
  0x7e   : > { %852 = vmatprep.subr.bf16.mxu0 %v1677_v36  ;;  %965 = vmatprep.subr.bf16.mxu1 %v1679_v37  ;;  %p1810_p3 = por %p1809_p5, %p1808_p0 }
  0x80   : > { %p1811_p6 = pnand %p1810_p3, %p1804_p13 }
  0x81   : > { %853 = vmatpush1.bf16.msra.mxu0 %v1681_v38  ;;  %966 = vmatpush1.bf16.msra.mxu1 %v1682_v39 }
  0x82   : > { %854 = vmatprep.subr.bf16.mxu0 %v1683_v40  ;;  %967 = vmatprep.subr.bf16.mxu1 %v1685_v41 }
  0x85   : > { %855 = vmatpush1.bf16.msra.mxu0 %v1687_v42  ;;  %968 = vmatpush1.bf16.msra.mxu1 %v1688_v43 }
  0x86   : > { %856 = vmatprep.subr.bf16.mxu0 %v1689_v44  ;;  %969 = vmatprep.subr.bf16.mxu1 %v1691_v45 }
  0x89   : > { %857 = vmatpush1.bf16.msra.mxu0 %v1693_v46  ;;  %970 = vmatpush1.bf16.msra.mxu1 %v1694_v47 }
  0x8a   : > { %858 = vmatprep.subr.bf16.mxu0 %v1695_v49  ;;  %971 = vmatprep.subr.bf16.mxu1 %v1697_v50 }
  0x8d   : > { %859 = vmatpush1.bf16.msra.mxu0 %v1699_v51  ;;  %972 = vmatpush1.bf16.msra.mxu1 %v1700_v52 }
  0x8e   : > { %860 = vmatprep.subr.bf16.mxu0 %v1701_v53  ;;  %973 = vmatprep.subr.bf16.mxu1 %v1703_v54 }
  0x91   : > { %861 = vmatpush1.bf16.msra.mxu0 %v1705_v55  ;;  %974 = vmatpush1.bf16.msra.mxu1 %v1706_v56 }
  0x92   : > { %862 = vmatprep.subr.bf16.mxu0 %v1707_v57  ;;  %975 = vmatprep.subr.bf16.mxu1 %v1709_v58 }
  0x95   : > { %863 = vmatpush1.bf16.msra.mxu0 %v1711_v59  ;;  %976 = vmatpush1.bf16.msra.mxu1 %v1712_v60 }
  0x96   : > { %864 = vmatprep.subr.bf16.mxu0 %v1713_v61  ;;  %977 = vmatprep.subr.bf16.mxu1 %v1715_v62 }
  0x99   : > { %865 = vmatpush1.bf16.msra.mxu0 %v1717_v63  ;;  %978 = vmatpush1.bf16.msra.mxu1 %v1718_v0 }
  0x9c   : > { %867 = vmatmul.mubr.bf16.vlgmr.msra.gmra.mrb[0].mxu0 %v1719_v1  ;;  %980 = vmatmul.mubr.bf16.vlgmr.msra.gmra.mrb[0].mxu1 %v1719_v1 }
  0x9d   : > { %876 = vmatprep.mubr.bf16.mxu0 %v1722_v2  ;;  %989 = vmatprep.mubr.bf16.mxu1 %v1722_v2 }
  0xa4   : > { %877 = vmatmul.mubr.bf16.gmra.mrb[4].mxu0 %v1724_v3  ;;  %990 = vmatmul.mubr.bf16.gmra.mrb[4].mxu1 %v1724_v3 }
  0xa5   : > { %886 = vmatprep.mubr.bf16.mxu0 %v1725_v4  ;;  %999 = vmatprep.mubr.bf16.mxu1 %v1725_v4 }
  0xac   : > { %887 = vmatmul.mubr.bf16.gmra.mrb[8].mxu0 %v1727_v5  ;;  %1000 = vmatmul.mubr.bf16.gmra.mrb[8].mxu1 %v1727_v5 }
  0xad   : > { %896 = vmatprep.mubr.bf16.mxu0 %v1728_v6  ;;  %1009 = vmatprep.mubr.bf16.mxu1 %v1728_v6 }
  0xb4   : > { %897 = vmatmul.mubr.bf16.gmra.mrb[12].mxu0 %v1730_v7  ;;  %1010 = vmatmul.mubr.bf16.gmra.mrb[12].mxu1 %v1730_v7 }
  0xb5   : > { %906 = vmatprep.mubr.bf16.mxu0 %v1731_v8  ;;  %1019 = vmatprep.mubr.bf16.mxu1 %v1731_v8 }
  0xbc   : > { %907 = vmatmul.mubr.bf16.gmra.mrb[16].mxu0 %v1733_v9  ;;  %1020 = vmatmul.mubr.bf16.gmra.mrb[16].mxu1 %v1733_v9 }
  0xbd   : > { %916 = vmatprep.mubr.bf16.mxu0 %v1734_v10  ;;  %1029 = vmatprep.mubr.bf16.mxu1 %v1734_v10 }
  0xc4   : > { %917 = vmatmul.mubr.bf16.gmra.mrb[20].mxu0 %v1736_v11  ;;  %1030 = vmatmul.mubr.bf16.gmra.mrb[20].mxu1 %v1736_v11 }
  0xc5   : > { %926 = vmatprep.mubr.bf16.mxu0 %v1737_v12  ;;  %1039 = vmatprep.mubr.bf16.mxu1 %v1737_v12 }
  0xcc   : > { %927 = vmatmul.mubr.bf16.gmra.mrb[24].mxu0 %v1739_v13  ;;  %1040 = vmatmul.mubr.bf16.gmra.mrb[24].mxu1 %v1739_v13 }
  0xcd   : > { %936 = vmatprep.mubr.bf16.mxu0 %v1740_v14  ;;  %1049 = vmatprep.mubr.bf16.mxu1 %v1740_v14 }
  0xd4   : > { %937 = vmatmul.mubr.bf16.gmra.mrb[28].mxu0 %v1742_v15  ;;  %1050 = vmatmul.mubr.bf16.gmra.mrb[28].mxu1 %v1742_v15 }
 0x16f   : > { %v868_v16 = vpop.f32.mrb[0].mxu0  ;;  %v981_v17 = vpop.f32.mrb[0].mxu1 }
 0x170   : > { %1255 = vst [vmem:[%s2142_s17] sm:$0xff] %v868_v16  ;;  %1257 = vst [vmem:[%s2142_s17 + $0x10] sm:$0xff] %v981_v17  ;;  %v870_v18 = vpop.f32.mrb[1].mxu0  ;;  %v983_v19 = vpop.f32.mrb[1].mxu1 }
 0x171   : > { %1256 = vst [vmem:[%s2142_s17 + $0x8] sm:$0xff] %v870_v18  ;;  %1258 = vst [vmem:[%s2142_s17 + $0x18] sm:$0xff] %v983_v19  ;;  %v872_v20 = vpop.f32.mrb[2].mxu0  ;;  %v985_v21 = vpop.f32.mrb[2].mxu1 }
 0x172   : > { %1259 = vst [vmem:[%s2142_s17 + $0x20] sm:$0xff] %v872_v20  ;;  %1261 = vst [vmem:[%s2142_s17 + $0x30] sm:$0xff] %v985_v21  ;;  %v874_v22 = vpop.f32.mrb[3].mxu0  ;;  %v987_v23 = vpop.f32.mrb[3].mxu1 }
 0x173   : > { %1260 = vst [vmem:[%s2142_s17 + $0x28] sm:$0xff] %v874_v22  ;;  %1262 = vst [vmem:[%s2142_s17 + $0x38] sm:$0xff] %v987_v23 }
 0x177   : > { %v878_v24 = vpop.f32.mrb[4].mxu0  ;;  %v991_v25 = vpop.f32.mrb[4].mxu1 }
 0x178   : > { %1263 = vst [vmem:[%s2142_s17 + $0x40] sm:$0xff] %v878_v24  ;;  %1265 = vst [vmem:[%s2142_s17 + $0x50] sm:$0xff] %v991_v25  ;;  %v880_v26 = vpop.f32.mrb[5].mxu0  ;;  %v993_v27 = vpop.f32.mrb[5].mxu1 }
 0x179   : > { %1264 = vst [vmem:[%s2142_s17 + $0x48] sm:$0xff] %v880_v26  ;;  %1266 = vst [vmem:[%s2142_s17 + $0x58] sm:$0xff] %v993_v27  ;;  %v882_v28 = vpop.f32.mrb[6].mxu0  ;;  %v995_v29 = vpop.f32.mrb[6].mxu1 }
 0x17a   : > { %1267 = vst [vmem:[%s2142_s17 + $0x60] sm:$0xff] %v882_v28  ;;  %1269 = vst [vmem:[%s2142_s17 + $0x70] sm:$0xff] %v995_v29  ;;  %v884_v30 = vpop.f32.mrb[7].mxu0  ;;  %v997_v31 = vpop.f32.mrb[7].mxu1 }
 0x17b   : > { %1268 = vst [vmem:[%s2142_s17 + $0x68] sm:$0xff] %v884_v30  ;;  %1270 = vst [vmem:[%s2142_s17 + $0x78] sm:$0xff] %v997_v31 }
 0x17f   : > { %v888_v32 = vpop.f32.mrb[8].mxu0  ;;  %v1001_v33 = vpop.f32.mrb[8].mxu1 }
 0x180   : > { %1271 = vst [vmem:[%s2142_s17 + $0x80] sm:$0xff] %v888_v32  ;;  %1273 = vst [vmem:[%s2142_s17 + $0x90] sm:$0xff] %v1001_v33  ;;  %v890_v34 = vpop.f32.mrb[9].mxu0  ;;  %v1003_v35 = vpop.f32.mrb[9].mxu1 }
 0x181   : > { %1272 = vst [vmem:[%s2142_s17 + $0x88] sm:$0xff] %v890_v34  ;;  %1274 = vst [vmem:[%s2142_s17 + $0x98] sm:$0xff] %v1003_v35  ;;  %v892_v36 = vpop.f32.mrb[10].mxu0  ;;  %v1005_v37 = vpop.f32.mrb[10].mxu1 }
 0x182   : > { %1275 = vst [vmem:[%s2142_s17 + $0xa0] sm:$0xff] %v892_v36  ;;  %1277 = vst [vmem:[%s2142_s17 + $0xb0] sm:$0xff] %v1005_v37  ;;  %v894_v38 = vpop.f32.mrb[11].mxu0  ;;  %v1007_v39 = vpop.f32.mrb[11].mxu1 }
 0x183   : > { %1276 = vst [vmem:[%s2142_s17 + $0xa8] sm:$0xff] %v894_v38  ;;  %1278 = vst [vmem:[%s2142_s17 + $0xb8] sm:$0xff] %v1007_v39 }
 0x187   : > { %v898_v40 = vpop.f32.mrb[12].mxu0  ;;  %v1011_v41 = vpop.f32.mrb[12].mxu1 }
 0x188   : > { %1279 = vst [vmem:[%s2142_s17 + $0xc0] sm:$0xff] %v898_v40  ;;  %1281 = vst [vmem:[%s2142_s17 + $0xd0] sm:$0xff] %v1011_v41  ;;  %v900_v42 = vpop.f32.mrb[13].mxu0  ;;  %v1013_v43 = vpop.f32.mrb[13].mxu1 }
 0x189   : > { %1280 = vst [vmem:[%s2142_s17 + $0xc8] sm:$0xff] %v900_v42  ;;  %1282 = vst [vmem:[%s2142_s17 + $0xd8] sm:$0xff] %v1013_v43  ;;  %v902_v44 = vpop.f32.mrb[14].mxu0  ;;  %v1015_v45 = vpop.f32.mrb[14].mxu1 }
 0x18a   : > { %1283 = vst [vmem:[%s2142_s17 + $0xe0] sm:$0xff] %v902_v44  ;;  %1285 = vst [vmem:[%s2142_s17 + $0xf0] sm:$0xff] %v1015_v45  ;;  %v904_v46 = vpop.f32.mrb[15].mxu0  ;;  %v1017_v47 = vpop.f32.mrb[15].mxu1 }
 0x18b   : > { %1284 = vst [vmem:[%s2142_s17 + $0xe8] sm:$0xff] %v904_v46  ;;  %1286 = vst [vmem:[%s2142_s17 + $0xf8] sm:$0xff] %v1017_v47 }
 0x18f   : > { %v908_v48 = vpop.f32.mrb[16].mxu0  ;;  %v1021_v49 = vpop.f32.mrb[16].mxu1 }
 0x190   : > { %1287 = vst [vmem:[%s2142_s17 + $0x100] sm:$0xff] %v908_v48  ;;  %1289 = vst [vmem:[%s2142_s17 + $0x110] sm:$0xff] %v1021_v49  ;;  %v910_v50 = vpop.f32.mrb[17].mxu0  ;;  %v1023_v51 = vpop.f32.mrb[17].mxu1 }
 0x191   : > { %1288 = vst [vmem:[%s2142_s17 + $0x108] sm:$0xff] %v910_v50  ;;  %1290 = vst [vmem:[%s2142_s17 + $0x118] sm:$0xff] %v1023_v51  ;;  %v912_v52 = vpop.f32.mrb[18].mxu0  ;;  %v1025_v53 = vpop.f32.mrb[18].mxu1 }
 0x192   : > { %1291 = vst [vmem:[%s2142_s17 + $0x120] sm:$0xff] %v912_v52  ;;  %1293 = vst [vmem:[%s2142_s17 + $0x130] sm:$0xff] %v1025_v53  ;;  %v914_v54 = vpop.f32.mrb[19].mxu0  ;;  %v1027_v55 = vpop.f32.mrb[19].mxu1 }
 0x193   : > { %1292 = vst [vmem:[%s2142_s17 + $0x128] sm:$0xff] %v914_v54  ;;  %1294 = vst [vmem:[%s2142_s17 + $0x138] sm:$0xff] %v1027_v55 }
 0x197   : > { %v918_v56 = vpop.f32.mrb[20].mxu0  ;;  %v1031_v57 = vpop.f32.mrb[20].mxu1 }
 0x198   : > { %1295 = vst [vmem:[%s2142_s17 + $0x140] sm:$0xff] %v918_v56  ;;  %1297 = vst [vmem:[%s2142_s17 + $0x150] sm:$0xff] %v1031_v57  ;;  %v920_v58 = vpop.f32.mrb[21].mxu0  ;;  %v1033_v59 = vpop.f32.mrb[21].mxu1 }
 0x199   : > { %1296 = vst [vmem:[%s2142_s17 + $0x148] sm:$0xff] %v920_v58  ;;  %1298 = vst [vmem:[%s2142_s17 + $0x158] sm:$0xff] %v1033_v59  ;;  %v922_v60 = vpop.f32.mrb[22].mxu0  ;;  %v1035_v61 = vpop.f32.mrb[22].mxu1 }
 0x19a   : > { %1299 = vst [vmem:[%s2142_s17 + $0x160] sm:$0xff] %v922_v60  ;;  %1301 = vst [vmem:[%s2142_s17 + $0x170] sm:$0xff] %v1035_v61  ;;  %v924_v62 = vpop.f32.mrb[23].mxu0  ;;  %v1037_v63 = vpop.f32.mrb[23].mxu1 }
 0x19b   : > { %1300 = vst [vmem:[%s2142_s17 + $0x168] sm:$0xff] %v924_v62  ;;  %1302 = vst [vmem:[%s2142_s17 + $0x178] sm:$0xff] %v1037_v63 }
 0x19f   : > { %v928_v0 = vpop.f32.mrb[24].mxu0  ;;  %v1041_v1 = vpop.f32.mrb[24].mxu1 }
 0x1a0   : > { %1303 = vst [vmem:[%s2142_s17 + $0x180] sm:$0xff] %v928_v0  ;;  %1305 = vst [vmem:[%s2142_s17 + $0x190] sm:$0xff] %v1041_v1  ;;  %v930_v2 = vpop.f32.mrb[25].mxu0  ;;  %v1043_v3 = vpop.f32.mrb[25].mxu1 }
 0x1a1   : > { %1304 = vst [vmem:[%s2142_s17 + $0x188] sm:$0xff] %v930_v2  ;;  %1306 = vst [vmem:[%s2142_s17 + $0x198] sm:$0xff] %v1043_v3  ;;  %v932_v4 = vpop.f32.mrb[26].mxu0  ;;  %v1045_v5 = vpop.f32.mrb[26].mxu1 }
 0x1a2   : > { %1307 = vst [vmem:[%s2142_s17 + $0x1a0] sm:$0xff] %v932_v4  ;;  %1309 = vst [vmem:[%s2142_s17 + $0x1b0] sm:$0xff] %v1045_v5  ;;  %v934_v6 = vpop.f32.mrb[27].mxu0  ;;  %v1047_v7 = vpop.f32.mrb[27].mxu1 }
 0x1a3   : > { %1308 = vst [vmem:[%s2142_s17 + $0x1a8] sm:$0xff] %v934_v6  ;;  %1310 = vst [vmem:[%s2142_s17 + $0x1b8] sm:$0xff] %v1047_v7 }
 0x1a7   : > { %v938_v8 = vpop.f32.mrb[28].mxu0  ;;  %v1051_v9 = vpop.f32.mrb[28].mxu1 }
 0x1a8   : > { %1311 = vst [vmem:[%s2142_s17 + $0x1c0] sm:$0xff] %v938_v8  ;;  %1313 = vst [vmem:[%s2142_s17 + $0x1d0] sm:$0xff] %v1051_v9  ;;  %v940_v10 = vpop.f32.mrb[29].mxu0  ;;  %v1053_v11 = vpop.f32.mrb[29].mxu1 }
 0x1a9   : > { %1312 = vst [vmem:[%s2142_s17 + $0x1c8] sm:$0xff] %v940_v10  ;;  %1314 = vst [vmem:[%s2142_s17 + $0x1d8] sm:$0xff] %v1053_v11  ;;  %v942_v12 = vpop.f32.mrb[30].mxu0  ;;  %v1055_v13 = vpop.f32.mrb[30].mxu1 }
 0x1aa   : > { %1315 = vst [vmem:[%s2142_s17 + $0x1e0] sm:$0xff] %v942_v12  ;;  %1317 = vst [vmem:[%s2142_s17 + $0x1f0] sm:$0xff] %v1055_v13  ;;  %v944_v14 = vpop.f32.mrb[31].mxu0  ;;  %v1057_v15 = vpop.f32.mrb[31].mxu1 }
 0x1ab   : > { %1316 = vst [vmem:[%s2142_s17 + $0x1e8] sm:$0xff] %v944_v14  ;;  %1318 = vst [vmem:[%s2142_s17 + $0x1f8] sm:$0xff] %v1057_v15 }
 0x1ac   : > { %1814 = shalt.err (!%p1811_p6)
}
 0x1ad   : > { %s1815_s5 = scalar_lea.hbm %s2205_s8, 8192  ;;  %s1819_s16 = scalar_lea.hbm %s2265_s2, 24576 }
 0x1ae   : > { %p1816_p12 = scmp.ne.s32.totalorder %s2205_s8, %s1815_s5  ;;  %p1820_p10 = scmp.lt.u32.totalorder %s2205_s8, %s2265_s2 }
 0x1af   : > { %p1821_p1 = scmp.lt.u32.totalorder %s1819_s16, %s1815_s5  ;;  %p1823_p9 = scmp.lt.u32.totalorder %s1815_s5, %s2205_s8 }
 0x1b0   : > { %p1817_p2 = pnand %p1816_p12, %p2284_p11 }
 0x1b1   : > { %p1822_p8 = por %p1821_p1, %p1820_p10 }
 0x1b2   : > { %p1818_p7 = pneg %p1817_p2 }
 0x1b3   : > { %p1824_p4 = por %p1823_p9, %p1822_p8 }
 0x1b5   : > { %p1825_p13 = pnand %p1824_p4, %p1818_p7 }
 0x1b7   : > { %1828 = shalt.err (!%p1825_p13)
}
 0x1b8   : > { %s1897_s26 = smov 512   ;;  %s1898_s17 = smov 1536  }
 0x1b9   : > { %s1899_s19 = smov 32  }
 0x1ba   : > { %1548 = dma.vmem_to_hbm [thread:$0]  (%p2284_p11), %s2209_s22, 8192, %s2205_s8, %s1320_s12, %s1897_s26, %s1898_s17, %s1899_s19  }
 0x1bb PF: > { %p1565_p0 = scmp.ge.s32.totalorder %s1887_s14, 2  ;;  %s1351_s25 = sand.u32 1, %s1867_s9  }
 0x1bc   : > { %p2285_p5 = scmp.ne.s32.totalorder %s2276_s21, 0  ;;  %s1352_s6 = scalar_lea.sflag [#allocation5], %s1351_s25 }
 0x1be   : > { %p1559_p3 = pnand %p1565_p0, %p2285_p5 }
 0x1c0   : > { %1862 = dma.done.wait (!%p1559_p3), %s1352_s6, 8192  }
 0x1c1   : > { %1864 = vsyncadd (!%p1559_p3), %s1352_s6, 4294959104  ;;  %s19_s14 = sadd.s32 1, %s1887_s14   ;;  %s2286_s9 = smov %s1871_s10 }
 0x1c2   : > { %p16_p6 = scmp.ge.s32.totalorder %s19_s14, 5   ;;  %s2287_s10 = smov %s1875_s11 }
 0x1c3   : > { %s2288_s11 = smov %s2025_s7  ;;  %s2289_s12 = smov %s1883_s13 }
 0x1c4   : > { %s2290_s13 = smov %s2292_s27  ;;  %18 = sbr.rel (!%p16_p6) target bundleno = 7 (0x7), region = 87 }
 0x1cb   :  { %1357 = vsyncpa [#allocation4], 1 }
 0x1cc   :  { %1359 = vsyncpa [#allocation4 + $0x1], 1 }
 0x1cd   :  { %1360 = vsyncpa [#allocation7], 1 }
 0x1ce   :  { %1362 = vsyncpa [#allocation7 + $0x1], 1 }
 0x1cf   :  { %1363 = vsyncpa [#allocation5], 1 }
 0x1d0   :  { %1365 = vsyncpa [#allocation5 + $0x1], 1 }

</bundles_post_ra>
